<compile_context>
chip_gen: v7x
topology: tpu7x:2x2x1
jax: 0.10.0
libtpu: 0.0.40
codegen_flags: <defaults>
</compile_context>

<pallas_src>
import functools
import math
import re

import jax
import jax.numpy as jnp
import numpy as np
from jax.experimental import pallas as pl
from jax.experimental.pallas import tpu as pltpu

_LANE = 128
_SUB_CHUNK = 512          # in-kernel lane sub-chunk (EUP/MXU overlap, bounded live range)


def _round_up(n, m):
    return ((n + m - 1) // m) * m


def _tpu_generation():
    """Best-effort TPU generation from the device kind string (0 = unknown)."""
    try:
        kind = jax.devices()[0].device_kind.lower()
    except Exception:
        return 0
    m = re.search(r"(\d+)", kind)
    return int(m.group(1)) if m else 0


# ----------------------------- Pallas kernel ---------------------------------

def _mlp_kernel(*refs, num_hidden, activation, compute_dtype, chunk):
    """refs = (x_ref, w0, b0, w1, b1, ..., w_last, out_ref); all VMEM.

    Shapes (batch on the lane axis):
      x_ref : (d_in, tile)    compute_dtype
      w_i   : (out_i, in_i)   compute_dtype (torch layout, used directly as W @ h)
      b_i   : (out_i, 1)      float32 (added to the f32 MXU accumulator)
      w_last: (d_out, in)     compute_dtype (bias-free last layer)
      out   : (d_out, tile)   float32
    """
    x_ref, out_ref = refs[0], refs[-1]
    p = refs[1:-1]

    if activation == "Tanh":
        act = jnp.tanh                        # EUP; bf16 on v6e/v7x ~doubles throughput
    elif activation == "ReLU":
        act = lambda v: jnp.maximum(v, 0)     # VPU
    else:
        raise ValueError(f"unsupported activation: {activation}")

    # Hoist parameter loads/casts out of the per-chunk loop (tiny, live in vregs).
    ws = [p[2 * i][...] for i in range(num_hidden)]
    bs = [p[2 * i + 1][...] for i in range(num_hidden)]
    w_last = p[-1][...]

    tile = x_ref.shape[-1]
    # Process the lane tile in sub-chunks so chunk c's tanh (EUP) can overlap the
    # MXU pushes of neighbouring chunks and activations never spill to VMEM.
    for c in range(tile // chunk):
        lo = c * chunk
        h = x_ref[:, lo:lo + chunk]                                    # (d_in, chunk)
        for w, b in zip(ws, bs):
            z = jnp.dot(w, h, preferred_element_type=jnp.float32) + b  # f32 accumulate
            h = act(z.astype(compute_dtype))
        out_ref[:, lo:lo + chunk] = jnp.dot(
            w_last, h, preferred_element_type=jnp.float32
        ).astype(out_ref.dtype)


# ------------------------------ wrapper ---------------------------------------

def blnn_forward(x, weights, biases, w_last, *, activation="Tanh",
                 batch_tile=4096, compute_dtype=None, transpose_output=True):
    """Full BLNN forward in a single Pallas kernel.

    x:          (B, d_in) f32
    weights[i]: (out_i, in_i)  torch Linear layout
    biases[i]:  (out_i,)
    w_last:     (d_out, in_last) torch layout, bias-free last layer
    compute_dtype: None -> bf16 on v6e/v7x, f32 otherwise. jnp.float32 for exact
                   module semantics.
    Returns (B, d_out) f32 (or (d_out, B) if transpose_output=False).
    """
    B, d_in = x.shape
    d_out = w_last.shape[0]
    num_hidden = len(weights)

    gen = _tpu_generation()
    if compute_dtype is None:
        compute_dtype = jnp.bfloat16 if gen >= 6 else jnp.float32
    compute_dtype = np.dtype(compute_dtype)
    num_tc = 2 if gen >= 7 else 1                   # v7x: two TensorCores per chip

    # ---- lane (batch) tiling -------------------------------------------------
    max_tile = _round_up(max(int(batch_tile), _LANE), _LANE)
    b_lanes = _round_up(B, _LANE)
    if num_tc >= 2 and b_lanes >= num_tc * _LANE:
        # Balanced split: one equal, 128-aligned step per TensorCore.
        tile = min(_round_up(-(-b_lanes // num_tc), _LANE), max_tile)
    else:
        # Single TC: never shrink the tile just to lengthen the grid — per-step
        # overhead dominates this tiny model.
        tile = min(b_lanes, max_tile)
    b_pad = _round_up(b_lanes, tile)
    grid = b_pad // tile
    chunk = math.gcd(tile, _SUB_CHUNK)

    # ---- parameters ------------------------------------------------------------
    # Weights in the compute dtype (halves weight DMA on v6e/v7x); biases stay f32
    # because they are added to the f32 MXU accumulator.
    params = []
    for w, b in zip(weights, biases):
        params.append(jnp.asarray(w).astype(compute_dtype))              # (out, in)
        params.append(jnp.asarray(b, jnp.float32).reshape(-1, 1))        # (out, 1)
    params.append(jnp.asarray(w_last).astype(compute_dtype))             # (d_out, in)

    # ---- input: put batch on the lane (minor) axis ------------------------------
    # allow_input_fusion[0] lets XLA fuse this transpose/cast/pad into the pallas
    # operand instead of materializing a second copy of x in HBM.
    x_t = jnp.asarray(x).astype(compute_dtype).T                         # (d_in, B)
    if b_pad != B:
        x_t = jnp.pad(x_t, ((0, 0), (0, b_pad - B)))                     # zero pad

    # ---- BlockSpecs --------------------------------------------------------------
    x_spec = pl.BlockSpec((d_in, tile), lambda i: (0, i))
    out_spec = pl.BlockSpec((d_out, tile), lambda i: (0, i))
    # Constant index_map => params are DMA'd only on the first grid step (the
    # pipeline elides copies when the block index is unchanged).
    param_specs = [pl.BlockSpec(p.shape, lambda i: (0, 0)) for p in params]

    # ---- advisory cost estimate for the XLA scheduler ----------------------------
    feat = [d_in] + [int(w.shape[0]) for w in weights] + [d_out]
    flops = 2 * b_pad * sum(a * b for a, b in zip(feat[:-1], feat[1:]))
    transc = b_pad * sum(int(w.shape[0]) for w in weights) if activation == "Tanh" else 0
    bytes_acc = int(x_t.size) * x_t.dtype.itemsize \
        + sum(int(p.size) * p.dtype.itemsize for p in params) \
        + d_out * b_pad * 4
    cost = pl.CostEstimate(flops=int(flops), transcendentals=int(transc),
                           bytes_accessed=int(bytes_acc))

    kernel = functools.partial(
        _mlp_kernel, num_hidden=num_hidden, activation=activation,
        compute_dtype=compute_dtype, chunk=chunk)

    out_t = pl.pallas_call(
        kernel,
        out_shape=jax.ShapeDtypeStruct((d_out, b_pad), jnp.float32),
        grid_spec=pltpu.PrefetchScalarGridSpec(
            num_scalar_prefetch=0,
            grid=(grid,),
            in_specs=[x_spec] + param_specs,
            out_specs=out_spec,
        ),
        compiler_params=pltpu.CompilerParams(
            dimension_semantics=("parallel",),
            allow_input_fusion=[True] + [False] * len(params),
        ),
        cost_estimate=cost,
    )(x_t, *params)

    out_t = out_t[:, :B]     # drop batch padding (padded lanes hold post-tanh garbage)
    return out_t.T if transpose_output else out_t


# ------------------------- deterministic param init ---------------------------

def _orthogonal(key, shape):
    """Deterministic orthogonal init, like torch.nn.init.orthogonal_. shape=(out,in)."""
    rows, cols = shape
    flat = jax.random.normal(key, (max(rows, cols), min(rows, cols)), jnp.float32)
    q, r = jnp.linalg.qr(flat)
    d = jnp.diagonal(r)
    q = q * jnp.where(d == 0, 1.0, jnp.sign(d))[None, :]
    if rows < cols:
        q = q.T
    return q[:rows, :cols]


def init_blnn_params(key, d_in, d_hidden, d_out):
    """Returns weights (torch layout (out, in)), biases, w_last (d_out, in)."""
    dims = [d_in] + list(d_hidden)
    weights, biases = [], []
    for i in range(len(d_hidden)):
        key, wk, bk = jax.random.split(key, 3)
        w = _orthogonal(wk, (dims[i + 1], dims[i]))
        bound = 1.0 / np.sqrt(dims[i])
        b = jax.random.uniform(bk, (dims[i + 1],), jnp.float32, -bound, bound)
        weights.append(w)
        biases.append(b)
    key, wk = jax.random.split(key)
    w_last = _orthogonal(wk, (d_out, d_hidden[-1]))
    return weights, biases, w_last


# ----------------------------- reference ---------------------------------------

def blnn_reference(x, weights, biases, w_last, activation="Tanh",
                   compute_dtype=jnp.float32):
    """Pure-JAX reference; compute_dtype mirrors the kernel's activation dtype."""
    compute_dtype = np.dtype(compute_dtype)
    act = jnp.tanh if activation == "Tanh" else (lambda v: jnp.maximum(v, 0))
    h = jnp.asarray(x).astype(compute_dtype)
    for w, b in zip(weights, biases):
        z = jnp.dot(h, jnp.asarray(w).astype(compute_dtype).T,
                    preferred_element_type=jnp.float32) + jnp.asarray(b, jnp.float32)
        h = act(z.astype(compute_dtype))
    return jnp.dot(h, jnp.asarray(w_last).astype(compute_dtype).T,
                   preferred_element_type=jnp.float32)


# ------------------------------- main -------------------------------------------

if __name__ == "__main__":
    # Double pendulum state (q1, q2, p1, p2) -> d_in = 4; predict 4-d time derivative.
    d_in, d_hidden, d_out = 4, [32, 32], 4

    key = jax.random.PRNGKey(0)
    key, pk = jax.random.split(key)
    weights, biases, w_last = init_blnn_params(pk, d_in, d_hidden, d_out)

    # 1) Exact module semantics (f32 activations), small batch (one 128-lane tile).
    key, xk = jax.random.split(key)
    x_small = jax.random.normal(xk, (16, d_in), jnp.float32)
    out = jax.block_until_ready(
        blnn_forward(x_small, weights, biases, w_last, activation="Tanh",
                     compute_dtype=jnp.float32))
    ref = blnn_reference(x_small, weights, biases, w_last, "Tanh")
    np.testing.assert_allclose(np.asarray(out), np.asarray(ref), rtol=1e-5, atol=1e-5)

    # 2) f32, non-multiple batch: exercises zero-padding and (on v7x) the balanced
    #    two-step parallel grid across both TensorCores.
    key, xk = jax.random.split(key)
    x_big = jax.random.normal(xk, (300, d_in), jnp.float32)
    out = jax.block_until_ready(
        blnn_forward(x_big, weights, biases, w_last, activation="Tanh",
                     compute_dtype=jnp.float32))
    ref = blnn_reference(x_big, weights, biases, w_last, "Tanh")
    np.testing.assert_allclose(np.asarray(out), np.asarray(ref), rtol=1e-5, atol=1e-5)

    # 3) ReLU path, f32.
    out = jax.block_until_ready(
        blnn_forward(x_big, weights, biases, w_last, activation="ReLU",
                     compute_dtype=jnp.float32))
    ref = blnn_reference(x_big, weights, biases, w_last, "ReLU")
    np.testing.assert_allclose(np.asarray(out), np.asarray(ref), rtol=1e-5, atol=1e-5)

    # 4) Auto compute dtype (bf16 activations on v6e/v7x, f32 elsewhere), checked
    #    against a numerics-matched reference.
    auto_dtype = jnp.bfloat16 if _tpu_generation() >= 6 else jnp.float32
    out = jax.block_until_ready(
        blnn_forward(x_big, weights, biases, w_last, activation="Tanh"))
    ref = blnn_reference(x_big, weights, biases, w_last, "Tanh", compute_dtype=auto_dtype)
    tol = 1e-5 if auto_dtype == jnp.float32 else 5e-2
    np.testing.assert_allclose(np.asarray(out), np.asarray(ref), rtol=tol, atol=tol)

    print("KERNEL_OK")
</pallas_src>

<mosaic_0001>
module attributes {stable_mosaic.version = 11 : i64} {
  func.func @_mlp_kernel(%arg0: i32, %arg1: memref<4x128xf32, #tpu.memory_space<vmem>>, %arg2: memref<32x4xf32, #tpu.memory_space<vmem>>, %arg3: memref<32x1xf32, #tpu.memory_space<vmem>>, %arg4: memref<32x32xf32, #tpu.memory_space<vmem>>, %arg5: memref<32x1xf32, #tpu.memory_space<vmem>>, %arg6: memref<4x32xf32, #tpu.memory_space<vmem>>, %arg7: memref<4x128xf32, #tpu.memory_space<vmem>>) attributes {dimension_semantics = [#tpu.dimension_semantics<parallel>], iteration_bounds = array<i64: 1>, scalar_prefetch = 0 : i64, scratch_operands = 0 : i64, tpu.core_type = #tpu.core_type<tc>, window_params = [{transform_indices = @transform_0, window_bounds = array<i64: 4, 128>}, {pipeline_mode = #tpu.pipeline_mode<synchronous>, transform_indices = @transform_1, window_bounds = array<i64: 32, 4>}, {pipeline_mode = #tpu.pipeline_mode<synchronous>, transform_indices = @transform_2, window_bounds = array<i64: 32, 1>}, {pipeline_mode = #tpu.pipeline_mode<synchronous>, transform_indices = @transform_3, window_bounds = array<i64: 32, 32>}, {pipeline_mode = #tpu.pipeline_mode<synchronous>, transform_indices = @transform_4, window_bounds = array<i64: 32, 1>}, {pipeline_mode = #tpu.pipeline_mode<synchronous>, transform_indices = @transform_5, window_bounds = array<i64: 4, 32>}, {transform_indices = @transform_6, window_bounds = array<i64: 4, 128>}]} {
    %c0 = arith.constant 0 : index
    %c0_0 = arith.constant 0 : index
    %0 = vector.load %arg2[%c0, %c0_0] : memref<32x4xf32, #tpu.memory_space<vmem>>, vector<32x4xf32>
    %c0_1 = arith.constant 0 : index
    %c0_2 = arith.constant 0 : index
    %1 = vector.load %arg4[%c0_1, %c0_2] : memref<32x32xf32, #tpu.memory_space<vmem>>, vector<32x32xf32>
    %c0_3 = arith.constant 0 : index
    %c0_4 = arith.constant 0 : index
    %2 = vector.load %arg3[%c0_3, %c0_4] : memref<32x1xf32, #tpu.memory_space<vmem>>, vector<32x1xf32>
    %c0_5 = arith.constant 0 : index
    %c0_6 = arith.constant 0 : index
    %3 = vector.load %arg5[%c0_5, %c0_6] : memref<32x1xf32, #tpu.memory_space<vmem>>, vector<32x1xf32>
    %c0_7 = arith.constant 0 : index
    %c0_8 = arith.constant 0 : index
    %4 = vector.load %arg6[%c0_7, %c0_8] : memref<4x32xf32, #tpu.memory_space<vmem>>, vector<4x32xf32>
    %c0_9 = arith.constant 0 : index
    %c0_10 = arith.constant 0 : index
    %5 = vector.load %arg1[%c0_9, %c0_10] : memref<4x128xf32, #tpu.memory_space<vmem>>, vector<4x128xf32>
    %cst = arith.constant dense<0.000000e+00> : vector<32x128xf32>
    %6 = tpu.matmul %0, %5, %cst {dimension_numbers = #tpu.dot_dimension_numbers<[1], [0], [0], [1], [0, 0, 1, 1], [], []>} : vector<32x4xf32>, vector<4x128xf32>, vector<32x128xf32> -> vector<32x128xf32>
    %7 = vector.broadcast %2 : vector<32x1xf32> to vector<32x128xf32>
    %8 = arith.addf %6, %7 : vector<32x128xf32>
    %9 = math.tanh %8 : vector<32x128xf32>
    %cst_11 = arith.constant dense<0.000000e+00> : vector<32x128xf32>
    %10 = tpu.matmul %1, %9, %cst_11 {dimension_numbers = #tpu.dot_dimension_numbers<[1], [0], [0], [1], [0, 0, 1, 1], [], []>} : vector<32x32xf32>, vector<32x128xf32>, vector<32x128xf32> -> vector<32x128xf32>
    %11 = vector.broadcast %3 : vector<32x1xf32> to vector<32x128xf32>
    %12 = arith.addf %10, %11 : vector<32x128xf32>
    %13 = math.tanh %12 : vector<32x128xf32>
    %cst_12 = arith.constant dense<0.000000e+00> : vector<4x128xf32>
    %14 = tpu.matmul %4, %13, %cst_12 {dimension_numbers = #tpu.dot_dimension_numbers<[1], [0], [0], [1], [0, 0, 1, 1], [], []>} : vector<4x32xf32>, vector<32x128xf32>, vector<4x128xf32> -> vector<4x128xf32>
    %c0_13 = arith.constant 0 : index
    %c0_14 = arith.constant 0 : index
    %15 = vector.load %arg7[%c0_13, %c0_14] : memref<4x128xf32, #tpu.memory_space<vmem>>, vector<4x128xf32>
    tpu.vector_store %arg7[%c0_13, %c0_14], %14 {strides = array<i32>} : memref<4x128xf32, #tpu.memory_space<vmem>>, vector<4x128xf32>,
    return
  }
  func.func @transform_0(%arg0: i32) -> (i32, i32) {
    %c0_i32 = arith.constant 0 : i32
    %c0_i32_0 = arith.constant 0 : i32
    return %c0_i32, %arg0 : i32, i32
  }
  func.func @transform_1(%arg0: i32) -> (i32, i32) {
    %c0_i32 = arith.constant 0 : i32
    %c0_i32_0 = arith.constant 0 : i32
    %c0_i32_1 = arith.constant 0 : i32
    return %c0_i32, %c0_i32_0 : i32, i32
  }
  func.func @transform_2(%arg0: i32) -> (i32, i32) {
    %c0_i32 = arith.constant 0 : i32
    %c0_i32_0 = arith.constant 0 : i32
    %c0_i32_1 = arith.constant 0 : i32
    return %c0_i32, %c0_i32_0 : i32, i32
  }
  func.func @transform_3(%arg0: i32) -> (i32, i32) {
    %c0_i32 = arith.constant 0 : i32
    %c0_i32_0 = arith.constant 0 : i32
    %c0_i32_1 = arith.constant 0 : i32
    return %c0_i32, %c0_i32_0 : i32, i32
  }
  func.func @transform_4(%arg0: i32) -> (i32, i32) {
    %c0_i32 = arith.constant 0 : i32
    %c0_i32_0 = arith.constant 0 : i32
    %c0_i32_1 = arith.constant 0 : i32
    return %c0_i32, %c0_i32_0 : i32, i32
  }
  func.func @transform_5(%arg0: i32) -> (i32, i32) {
    %c0_i32 = arith.constant 0 : i32
    %c0_i32_0 = arith.constant 0 : i32
    %c0_i32_1 = arith.constant 0 : i32
    return %c0_i32, %c0_i32_0 : i32, i32
  }
  func.func @transform_6(%arg0: i32) -> (i32, i32) {
    %c0_i32 = arith.constant 0 : i32
    %c0_i32_0 = arith.constant 0 : i32
    return %c0_i32, %arg0 : i32, i32
  }
}

</mosaic_0001>

<bundles_post_ra>
// kernel: tpu_custom_call.1
= control target key start
LH: loop header
LB: loop body
LE: loop exit
PB: predicated region body
PF: predicated region fallthrough
CT: control target
= control target key end

     0   :  { %vm75_vm0 = vcmask 1043456   ;;  %vm62_vm1 = vcmask 31744   ;;  %v500_v5 = vmov 0   ;;  %s615_s0 = inlined_call_operand.vmem [shape: f32[4,128], index: 0, kind: input, shape index: {}]   ;;  %s616_s1 = inlined_call_operand.vmem [shape: f32[32,4], index: 1, kind: input, shape index: {}]   ;;  %s617_s2 = inlined_call_operand.vmem [shape: f32[32,1], index: 2, kind: input, shape index: {}]   ;;  %s618_s3 = inlined_call_operand.vmem [shape: f32[32,32], index: 3, kind: input, shape index: {}]   ;;  %s619_s4 = inlined_call_operand.vmem [shape: f32[32,1], index: 4, kind: input, shape index: {}]   ;;  %s620_s5 = inlined_call_operand.vmem [shape: f32[4,32], index: 5, kind: input, shape index: {}]   ;;  %s621_s6 = inlined_call_operand.hbm [shape: f32[4,128], index: 6, kind: output, shape index: {}]  }
   0x1   :  { %v41_v0 = vld [vmem:[%s615_s0] sm:$0xf]  ;;  %v25_v2 = vld [vmem:[%s616_s1 + $0x8] sm:$0xff]  ;;  %v26_v3 = vld [vmem:[%s616_s1 + $0x10] sm:$0xff]  ;;  %458 = vset.pattern.permute.xlu0 %v500_v5  ;;  %459 = vset.pattern.permute.xlu1 %v500_v5 }
   0x2   :  { %v24_v1 = vld [vmem:[%s616_s1] sm:$0xff]  ;;  %406 = vmatprep.subr.msk.mxu0 %vm75_vm0, %v41_v0  ;;  %v34_v6 = vld [vmem:[%s617_s2 + $0x10] sm:$0xff]  ;;  %v27_v7 = vld [vmem:[%s616_s1 + $0x18] sm:$0xff] }
   0x3   :  { %408 = vmatprep.mubr.msk.f32.mxu0 %vm62_vm1, %v24_v1  ;;  %v32_v4 = vld [vmem:[%s617_s2] sm:$0xff]  ;;  %407 = vmatpush3.msk.msra.mxu0 %vm75_vm0, %v41_v0  ;;  %v33_v8 = vld [vmem:[%s617_s2 + $0x8] sm:$0xff] }
   0x4   :  { %409 = vmatmul.mubr.msk.f32.vlgmr.msra.gmra.mrb[0].mxu0 %vm62_vm1, %v25_v2  ;;  %44 = vperm.xlu0 %458, %v32_v4  }
   0x5   :  { %411 = vmatprep.mubr.msk.f32.mxu0 %vm62_vm1, %v26_v3 }
   0x6   :  { %11 = vsyncpa [#allocation3], 0  ;;  %54 = vperm.xlu1 %459, %v34_v6   ;;  %v35_v9 = vld [vmem:[%s617_s2 + $0x18] sm:$0xff]  ;;  %v36_v10 = vld [vmem:[%s619_s4] sm:$0xff]  ;;  %vm188_vm2 = vcmask 261120   ;;  %v501_v36 = vmov 0.0|0.0  }
   0x7   :  { %v37_v11 = vld [vmem:[%s619_s4 + $0x8] sm:$0xff]  ;;  %v38_v12 = vld [vmem:[%s619_s4 + $0x10] sm:$0xff]  ;;  %v39_v13 = vld [vmem:[%s619_s4 + $0x18] sm:$0xff]  ;;  %447 = vmatprep.subr.bf16.mxu0 %v501_v36  ;;  %vm502_vm3 = vmmov 0   ;;  %v503_v37 = vmov 0.0   ;;  %s504_s28 = smov [#allocation2]  }
   0x8   :  { %412 = vmatmul.mubr.msk.f32.gmra.mrb[2].mxu0 %vm62_vm1, %v27_v7  ;;  %49 = vperm.xlu0 %458, %v33_v8   ;;  %v28_v14 = vld [vmem:[%s618_s3] sm:$0xff]  ;;  %v29_v33 = vld [vmem:[%s618_s3 + $0x8] sm:$0xff]  ;;  %v30_v34 = vld [vmem:[%s618_s3 + $0x10] sm:$0xff]  ;;  %s370_s29 = sshll.u32 %s504_s28, 4  ;;  %s371_s29 = int_to_ptr.vmem [resolvable:$true] %s370_s29 }
   0x9   :  { %422 = vmatprep.mubr.msk.f32.mxu1 %vm188_vm2, %v28_v14  ;;  %v31_v35 = vld [vmem:[%s618_s3 + $0x18] sm:$0xff]  ;;  %436 = vmatprep.mubr.msk.f32.mxu0 %vm502_vm3, %v503_v37  ;;  %v40_v56 = vld [vmem:[%s620_s5] sm:$0xf]  ;;  %s476_s30 = scalar_lea.vmem %s371_s29, 64  ;;  %p481_p1 = scmp.lt.s32.totalorder %s371_s29, %s371_s29 }
   0xa   :  { %59 = vperm.xlu1 %459, %v35_v9   ;;  %p477_p0 = scmp.ne.s32.totalorder %s371_s29, %s476_s30  ;;  %p482_p2 = scmp.lt.s32.totalorder %s476_s30, %s476_s30 }
   0xc   :  { %170 = vperm.xlu0 %458, %v36_v10   ;;  %p483_p3 = por %p482_p2, %p481_p1 }
   0xe   :  { %175 = vperm.xlu1 %459, %v37_v11   ;;  %p484_p4 = pnand %p483_p3, %p477_p0 }
  0x10   :  { %180 = vperm.xlu0 %458, %v38_v12  }
  0x12   :  { %185 = vperm.xlu1 %459, %v39_v13  }
  0x83   :  { %v45_v15 = vpop.permute.xlu0 %44 }
  0x85   :  { %v55_v16 = vpop.permute.xlu1 %54 }
  0x87   :  { %v50_v17 = vpop.permute.xlu0 %49 }
  0x89   :  { %v60_v22 = vpop.permute.xlu1 %59 }
  0x8b   :  { %v171_v39 = vpop.permute.xlu0 %170 }
  0x8d   :  { %v176_v38 = vpop.permute.xlu1 %175 }
  0x8f   :  { %v181_v46 = vpop.permute.xlu0 %180 }
  0x91   :  { %v186_v44 = vpop.permute.xlu1 %185 }
  0xd7   :  { %v410_v18 = vpop.f32.mrb[0].mxu0 }
  0xd8   :  { %v151_v19 = vadd.f32 %v410_v18, %v50_v17  ;;  %v145_v20 = vpop.f32.mrb[1].mxu0 }
  0xd9   :  { %v146_v21 = vadd.f32 %v145_v20, %v45_v15 }
  0xda   :  { %460 = vtanh.f32 %v151_v19 }
  0xdb   :  { %462 = vtanh.f32 %v146_v21  ;;  %v413_v23 = vpop.f32.mrb[2].mxu0 }
  0xdc   :  { %v161_v24 = vadd.f32 %v413_v23, %v60_v22  ;;  %v155_v25 = vpop.f32.mrb[3].mxu0 }
  0xdd   :  { %v156_v26 = vadd.f32 %v155_v25, %v55_v16 }
  0xde   :  { %464 = vtanh.f32 %v161_v24 }
  0xdf   :  { %466 = vtanh.f32 %v156_v26 }
  0xe4   :  { %v461_v27 = vpop.eup %460 }
  0xe5   :  { %v463_v28 = vpop.eup %462 }
  0xe6   :  { %v439_v29 = vpack.c.bf16 %v461_v27, %v463_v28 }
  0xe8   :  { %v465_v30 = vpop.eup %464  ;;  %440 = vmatprep.subr.bf16.mxu1 %v439_v29 }
  0xe9   :  { %v467_v31 = vpop.eup %466  ;;  %442 = vmatpush3.bf16.msra.mxu1 %v439_v29 }
  0xea   :  { %v443_v32 = vpack.c.bf16 %v465_v30, %v467_v31 }
  0xec   :  { %444 = vmatprep.subr.bf16.mxu1 %v443_v32 }
  0xed   :  { %446 = vmatpush3.bf16.msra.mxu1 %v443_v32 }
  0xf0   :  { %423 = vmatmul.mubr.msk.f32.vlgmr.msra.gmra.mrb[0].mxu1 %vm188_vm2, %v29_v33 }
  0xf1   :  { %425 = vmatprep.mubr.msk.f32.mxu1 %vm188_vm2, %v30_v34 }
  0xf4   :  { %426 = vmatmul.mubr.msk.f32.gmra.mrb[2].mxu1 %vm188_vm2, %v31_v35 }
 0x1c3   :  { %v424_v40 = vpop.f32.mrb[0].mxu1 }
 0x1c4   :  { %v273_v41 = vadd.f32 %v424_v40, %v176_v38  ;;  %v267_v42 = vpop.f32.mrb[1].mxu1 }
 0x1c5   :  { %v268_v43 = vadd.f32 %v267_v42, %v171_v39 }
 0x1c6   :  { %468 = vtanh.f32 %v273_v41 }
 0x1c7   :  { %470 = vtanh.f32 %v268_v43  ;;  %v427_v45 = vpop.f32.mrb[2].mxu1 }
 0x1c8   :  { %v283_v47 = vadd.f32 %v427_v45, %v186_v44  ;;  %v277_v48 = vpop.f32.mrb[3].mxu1 }
 0x1c9   :  { %v278_v49 = vadd.f32 %v277_v48, %v181_v46 }
 0x1ca   :  { %472 = vtanh.f32 %v283_v47 }
 0x1cb   :  { %474 = vtanh.f32 %v278_v49 }
 0x1d0   :  { %v469_v50 = vpop.eup %468 }
 0x1d1   :  { %v471_v51 = vpop.eup %470 }
 0x1d2   :  { %v448_v52 = vpack.c.bf16 %v469_v50, %v471_v51 }
 0x1d4   :  { %v473_v53 = vpop.eup %472  ;;  %449 = vmatpush3.bf16.msra.mxu0 %v448_v52 }
 0x1d5   :  { %v475_v54 = vpop.eup %474  ;;  %450 = vmatprep.subr.bf16.mxu0 %v501_v36 }
 0x1d6   :  { %v451_v55 = vpack.c.bf16 %v473_v53, %v475_v54 }
 0x1d8   :  { %452 = vmatpush3.bf16.msra.mxu0 %v451_v55 }
 0x1db   :  { %437 = vmatmul.mubr.msk.f32.vlgmr.msra.gmra.mrb[4].mxu0 %vm188_vm2, %v40_v56 }
 0x2ae   :  { %v359_v57 = vpop.f32.mrb[4].mxu0 }
 0x2af   :  { %363 = vst [vmem:[#allocation2] sm:$0xf] %v359_v57  ;;  %v438_v58 = vpop.f32.mrb[5].mxu0 }
 0x2b0   :  { %487 = shalt.err (!%p484_p4)
}
 0x2b1   :  { %s488_s8 = scalar_lea.hbm %s621_s6, 64 }
 0x2b2   :  { %p489_p5 = scmp.ne.s32.totalorder %s621_s6, %s488_s8  ;;  %p492_p6 = scmp.lt.u32.totalorder %s488_s8, %s621_s6 }
 0x2b4   :  { %p494_p7 = pnand %p492_p6, %p489_p5 }
 0x2b6   :  { %497 = shalt.err (!%p494_p7)
}
 0x2b7   :  { %373 = dma.vmem_to_hbm [thread:$0]  %s371_s29, 64, %s621_s6, [#allocation3]  }
 0x2b8   :  { %498 = dma.done.wait [#allocation3], 64  }
 0x2b9   :  { %499 = vsyncadd [#allocation3], 4294967232 }
 0x2ba   :  { %377 = vsyncpa [#allocation3], 1 }

</bundles_post_ra>
